<compile_context>
chip_gen: v5e
topology: v5e:2x2
jax: 0.10.0
libtpu: 0.0.40
codegen_flags: <defaults>
</compile_context>

<pallas_src>
import jax
import jax.numpy as jnp
from jax.experimental import pallas as pl
from jax.experimental.pallas import tpu as pltpu


def _cbam_c_kernel(x_ref, w1_ref, b1_ref, w2_ref, b2_ref, o_ref):
    """One batch element per grid step.

    x_ref : (1, C, HW)  native dtype
    w1_ref: (hid, C) f32 (PyTorch mlp1.weight layout)
    b1_ref: (hid, 1) f32
    w2_ref: (C, hid) f32 (PyTorch mlp2.weight layout)
    b2_ref: (C, 1)   f32
    o_ref : (1, C, HW)
    """
    x = x_ref[0]                                   # (C, HW), native dtype
    inv_hw = 1.0 / x.shape[-1]

    # Single traversal of the tile: sum (f32 accumulation) + max over the
    # lane (spatial) axis. Results stay column-shaped (C, 1) -> no relayout.
    s = jnp.sum(x, axis=-1, keepdims=True, dtype=jnp.float32)      # (C, 1)
    mx = jnp.max(x, axis=-1, keepdims=True).astype(jnp.float32)    # (C, 1)
    desc = jnp.concatenate([s * inv_hw, mx], axis=1)               # (C, 2)

    # Shared 2-layer MLP applied once to both descriptors (transposed form:
    # W1 @ desc == (desc^T @ W1^T)^T, so PyTorch weights are used as-is).
    h = jnp.dot(w1_ref[...], desc, preferred_element_type=jnp.float32)
    h = jnp.maximum(h + b1_ref[...], 0.0)                          # (hid, 2)
    a = jnp.dot(w2_ref[...], h, preferred_element_type=jnp.float32)
    a = a + b2_ref[...]                                            # (C, 2)

    attn = jax.nn.sigmoid(a[:, 0:1] + a[:, 1:2])                   # (C, 1)

    # fusion == 'scale': broadcast multiply in native dtype, lane-dense store.
    o_ref[0] = (x * attn.astype(x.dtype)).astype(o_ref.dtype)


def cbam_c(x, w1, b1, w2, b2):
    """CBAM_C forward (fusion='scale', activation=ReLU).

    x : (B, C, H, W)
    w1: PyTorch mlp1.weight, shape (hidden, C)
    b1: mlp1.bias, shape (hidden,)
    w2: PyTorch mlp2.weight, shape (C, hidden)
    b2: mlp2.bias, shape (C,)
    """
    B, C, H, W = x.shape
    HW = H * W
    x3 = x.reshape(B, C, HW)                       # lane-dense view (free)

    w1_p = jnp.asarray(w1, jnp.float32)            # (hid, C)
    w2_p = jnp.asarray(w2, jnp.float32)            # (C, hid)
    b1_c = jnp.asarray(b1, jnp.float32)[:, None]   # (hid, 1)
    b2_c = jnp.asarray(b2, jnp.float32)[:, None]   # (C, 1)

    # VMEM budget: double-buffered x + out blocks, plus params + headroom.
    itemsize = jnp.dtype(x.dtype).itemsize
    block_bytes = C * HW * itemsize
    param_bytes = 4 * (w1_p.size + w2_p.size + b1_c.size + b2_c.size)
    vmem_bytes = 2 * (2 * 2 * block_bytes + param_bytes)
    vmem_bytes = int(min(max(vmem_bytes, 16 * 1024 * 1024), 48 * 1024 * 1024))

    def full_spec(shape):
        return pl.BlockSpec(shape, lambda b: (0,) * len(shape))

    out3 = pl.pallas_call(
        _cbam_c_kernel,
        out_shape=jax.ShapeDtypeStruct((B, C, HW), x.dtype),
        grid=(B,),
        in_specs=[
            pl.BlockSpec((1, C, HW), lambda b: (b, 0, 0)),
            full_spec(w1_p.shape),
            full_spec(b1_c.shape),
            full_spec(w2_p.shape),
            full_spec(b2_c.shape),
        ],
        out_specs=pl.BlockSpec((1, C, HW), lambda b: (b, 0, 0)),
        compiler_params=pltpu.CompilerParams(
            dimension_semantics=("parallel",),
            vmem_limit_bytes=vmem_bytes,
        ),
    )(x3, w1_p, b1_c, w2_p, b2_c)

    return out3.reshape(B, C, H, W)


def _reference(x, w1, b1, w2, b2):
    # Pure-JAX reference matching the PyTorch module (fusion='scale', ReLU).
    xf = x.astype(jnp.float32)
    avg = jnp.mean(xf, axis=(2, 3))
    mx = jnp.max(xf, axis=(2, 3))

    def mlp(v):
        h = jnp.maximum(v @ w1.T + b1, 0.0)
        return h @ w2.T + b2

    attn = jax.nn.sigmoid(mlp(avg) + mlp(mx))[:, :, None, None]
    return (xf * attn).astype(x.dtype)


if __name__ == "__main__":
    # in_channels must be >= r for a non-empty hidden layer (C // r).
    B, C, H, W = 2, 32, 16, 16
    r = 16
    hidden = C // r  # = 2

    key = jax.random.PRNGKey(0)
    kx, kw1, kb1, kw2, kb2 = jax.random.split(key, 5)

    x = jax.random.normal(kx, (B, C, H, W), dtype=jnp.float32)
    # PyTorch Linear parameter shapes: weight (out, in), bias (out,).
    w1 = jax.random.normal(kw1, (hidden, C), dtype=jnp.float32) * 0.1
    b1 = jax.random.normal(kb1, (hidden,), dtype=jnp.float32) * 0.1
    w2 = jax.random.normal(kw2, (C, hidden), dtype=jnp.float32) * 0.1
    b2 = jax.random.normal(kb2, (C,), dtype=jnp.float32) * 0.1

    out = jax.block_until_ready(cbam_c(x, w1, b1, w2, b2))
    ref = _reference(x, w1, b1, w2, b2)

    assert out.shape == (B, C, H, W)
    assert jnp.allclose(out, ref, atol=1e-5, rtol=1e-5), "mismatch vs reference"

    print("KERNEL_OK")
</pallas_src>

<mosaic_0001>
module attributes {stable_mosaic.version = 11 : i64} {
  func.func @_cbam_c_kernel(%arg0: i32, %arg1: memref<1x32x256xf32, #tpu.memory_space<vmem>>, %arg2: memref<2x32xf32, #tpu.memory_space<vmem>>, %arg3: memref<2x1xf32, #tpu.memory_space<vmem>>, %arg4: memref<32x2xf32, #tpu.memory_space<vmem>>, %arg5: memref<32x1xf32, #tpu.memory_space<vmem>>, %arg6: memref<1x32x256xf32, #tpu.memory_space<vmem>>) attributes {dimension_semantics = [#tpu.dimension_semantics<parallel>], iteration_bounds = array<i64: 2>, scalar_prefetch = 0 : i64, scratch_operands = 0 : i64, tpu.core_type = #tpu.core_type<tc>, window_params = [{transform_indices = @transform_0, window_bounds = array<i64: 1, 32, 256>}, {pipeline_mode = #tpu.pipeline_mode<synchronous>, transform_indices = @transform_1, window_bounds = array<i64: 2, 32>}, {pipeline_mode = #tpu.pipeline_mode<synchronous>, transform_indices = @transform_2, window_bounds = array<i64: 2, 1>}, {pipeline_mode = #tpu.pipeline_mode<synchronous>, transform_indices = @transform_3, window_bounds = array<i64: 32, 2>}, {pipeline_mode = #tpu.pipeline_mode<synchronous>, transform_indices = @transform_4, window_bounds = array<i64: 32, 1>}, {transform_indices = @transform_5, window_bounds = array<i64: 1, 32, 256>}]} {
    %c0 = arith.constant 0 : index
    %c0_0 = arith.constant 0 : index
    %c0_1 = arith.constant 0 : index
    %0 = vector.load %arg1[%c0, %c0_0, %c0_1] : memref<1x32x256xf32, #tpu.memory_space<vmem>>, vector<1x32x256xf32>
    %1 = vector.shape_cast %0 : vector<1x32x256xf32> to vector<32x256xf32>
    %cst = arith.constant dense<0.000000e+00> : vector<32xf32>
    %2 = vector.multi_reduction <add>, %1, %cst [1] : vector<32x256xf32> to vector<32xf32>
    %3 = vector.shape_cast %2 : vector<32xf32> to vector<32x1xf32>
    %cst_2 = arith.constant dense<0xFF800000> : vector<32xf32>
    %4 = vector.multi_reduction <maximumf>, %1, %cst_2 [1] : vector<32x256xf32> to vector<32xf32>
    %5 = vector.shape_cast %4 : vector<32xf32> to vector<32x1xf32>
    %cst_3 = arith.constant 3.906250e-03 : f32
    %6 = vector.broadcast %cst_3 : f32 to vector<32x1xf32>
    %7 = arith.mulf %3, %6 : vector<32x1xf32>
    %8 = tpu.concatenate %7, %5 in 1 : vector<32x1xf32>, vector<32x1xf32> -> vector<32x2xf32>
    %c0_4 = arith.constant 0 : index
    %c0_5 = arith.constant 0 : index
    %9 = vector.load %arg2[%c0_4, %c0_5] : memref<2x32xf32, #tpu.memory_space<vmem>>, vector<2x32xf32>
    %cst_6 = arith.constant dense<0.000000e+00> : vector<2x2xf32>
    %10 = tpu.matmul %9, %8, %cst_6 {dimension_numbers = #tpu.dot_dimension_numbers<[1], [0], [0], [1], [0, 0, 1, 1], [], []>} : vector<2x32xf32>, vector<32x2xf32>, vector<2x2xf32> -> vector<2x2xf32>
    %c0_7 = arith.constant 0 : index
    %c0_8 = arith.constant 0 : index
    %11 = vector.load %arg3[%c0_7, %c0_8] : memref<2x1xf32, #tpu.memory_space<vmem>>, vector<2x1xf32>
    %12 = vector.broadcast %11 : vector<2x1xf32> to vector<2x2xf32>
    %13 = arith.addf %10, %12 : vector<2x2xf32>
    %cst_9 = arith.constant 0.000000e+00 : f32
    %14 = vector.broadcast %cst_9 : f32 to vector<2x2xf32>
    %15 = arith.maximumf %13, %14 : vector<2x2xf32>
    %c0_10 = arith.constant 0 : index
    %c0_11 = arith.constant 0 : index
    %16 = vector.load %arg4[%c0_10, %c0_11] : memref<32x2xf32, #tpu.memory_space<vmem>>, vector<32x2xf32>
    %cst_12 = arith.constant dense<0.000000e+00> : vector<32x2xf32>
    %17 = tpu.matmul %16, %15, %cst_12 {dimension_numbers = #tpu.dot_dimension_numbers<[1], [0], [0], [1], [0, 0, 1, 1], [], []>} : vector<32x2xf32>, vector<2x2xf32>, vector<32x2xf32> -> vector<32x2xf32>
    %c0_13 = arith.constant 0 : index
    %c0_14 = arith.constant 0 : index
    %18 = vector.load %arg5[%c0_13, %c0_14] : memref<32x1xf32, #tpu.memory_space<vmem>>, vector<32x1xf32>
    %19 = vector.broadcast %18 : vector<32x1xf32> to vector<32x2xf32>
    %20 = arith.addf %17, %19 : vector<32x2xf32>
    %21 = vector.extract_strided_slice %20 {offsets = [0, 0], sizes = [32, 1], strides = [1, 1]} : vector<32x2xf32> to vector<32x1xf32>
    %22 = vector.extract_strided_slice %20 {offsets = [0, 1], sizes = [32, 1], strides = [1, 1]} : vector<32x2xf32> to vector<32x1xf32>
    %23 = arith.addf %21, %22 : vector<32x1xf32>
    %24 = arith.negf %23 : vector<32x1xf32>
    %25 = math.exp %24 : vector<32x1xf32>
    %cst_15 = arith.constant 1.000000e+00 : f32
    %26 = vector.broadcast %cst_15 : f32 to vector<32x1xf32>
    %27 = arith.addf %26, %25 : vector<32x1xf32>
    %28 = arith.divf %26, %27 : vector<32x1xf32>
    %29 = vector.broadcast %28 : vector<32x1xf32> to vector<32x256xf32>
    %30 = arith.mulf %1, %29 : vector<32x256xf32>
    %c0_16 = arith.constant 0 : index
    %c0_17 = arith.constant 0 : index
    %c0_18 = arith.constant 0 : index
    %31 = vector.load %arg6[%c0_16, %c0_17, %c0_18] : memref<1x32x256xf32, #tpu.memory_space<vmem>>, vector<1x32x256xf32>
    %32 = vector.shape_cast %31 : vector<1x32x256xf32> to vector<32x256xf32>
    %33 = vector.shape_cast %30 : vector<32x256xf32> to vector<1x32x256xf32>
    tpu.vector_store %arg6[%c0_16, %c0_17, %c0_18], %33 {strides = array<i32>} : memref<1x32x256xf32, #tpu.memory_space<vmem>>, vector<1x32x256xf32>,
    return
  }
  func.func @transform_0(%arg0: i32) -> (i32, i32, i32) {
    %c0_i32 = arith.constant 0 : i32
    %c0_i32_0 = arith.constant 0 : i32
    %c0_i32_1 = arith.constant 0 : i32
    return %arg0, %c0_i32, %c0_i32_0 : i32, i32, i32
  }
  func.func @transform_1(%arg0: i32) -> (i32, i32) {
    %c0_i32 = arith.constant 0 : i32
    %c0_i32_0 = arith.constant 0 : i32
    %c0_i32_1 = arith.constant 0 : i32
    return %c0_i32, %c0_i32_0 : i32, i32
  }
  func.func @transform_2(%arg0: i32) -> (i32, i32) {
    %c0_i32 = arith.constant 0 : i32
    %c0_i32_0 = arith.constant 0 : i32
    %c0_i32_1 = arith.constant 0 : i32
    return %c0_i32, %c0_i32_0 : i32, i32
  }
  func.func @transform_3(%arg0: i32) -> (i32, i32) {
    %c0_i32 = arith.constant 0 : i32
    %c0_i32_0 = arith.constant 0 : i32
    %c0_i32_1 = arith.constant 0 : i32
    return %c0_i32, %c0_i32_0 : i32, i32
  }
  func.func @transform_4(%arg0: i32) -> (i32, i32) {
    %c0_i32 = arith.constant 0 : i32
    %c0_i32_0 = arith.constant 0 : i32
    %c0_i32_1 = arith.constant 0 : i32
    return %c0_i32, %c0_i32_0 : i32, i32
  }
  func.func @transform_5(%arg0: i32) -> (i32, i32, i32) {
    %c0_i32 = arith.constant 0 : i32
    %c0_i32_0 = arith.constant 0 : i32
    %c0_i32_1 = arith.constant 0 : i32
    return %arg0, %c0_i32, %c0_i32_0 : i32, i32, i32
  }
}

</mosaic_0001>

<bundles_post_ra>
// kernel: tpu_custom_call.1
= control target key start
LH: loop header
LB: loop body
LE: loop exit
PB: predicated region body
PF: predicated region fallthrough
CT: control target
= control target key end

     0   :  { %10 = vsyncpa [#allocation3], 0  ;;  %s1051_s0 = inlined_call_operand.hbm [shape: f32[2,32,256], index: 0, kind: input, shape index: {}]   ;;  %s1052_s1 = inlined_call_operand.vmem [shape: f32[2,32], index: 1, kind: input, shape index: {}]   ;;  %s1053_s2 = inlined_call_operand.vmem [shape: f32[2,1], index: 2, kind: input, shape index: {}]   ;;  %s1054_s3 = inlined_call_operand.vmem [shape: f32[32,2], index: 3, kind: input, shape index: {}]   ;;  %s1055_s4 = inlined_call_operand.vmem [shape: f32[32,1], index: 4, kind: input, shape index: {}]   ;;  %s1056_s5 = inlined_call_operand.hbm [shape: f32[2,32,256], index: 5, kind: output, shape index: {}]  }
   0x1   :  { %12 = vsyncpa [#allocation3 + $0x1], 0 }
   0x2   :  { %13 = vsyncpa [#allocation4], 0 }
   0x3   :  { %15 = vsyncpa [#allocation4 + $0x1], 0  ;;  %s846_s18 = smov 0   ;;  %s848_s19 = smov 0  }
   0x4   :  { %s850_s20 = smov 0   ;;  %s852_s21 = smov 0  }
   0x5 LB: > { %s867_s22 = sadd.s32 4294967295, %s808_s21   ;;  %s613_s23 = sadd.s32 4294967294, %s808_s21   ;;  %s808_s21 = sphi %s852_s21, %s1066_s21   ;;  %s804_s20 = sphi %s850_s20, %s1065_s20   ;;  %s800_s19 = sphi %s848_s19, %s1064_s19   ;;  %s796_s18 = sphi %s846_s18, %s1063_s18  }
   0x6   : > { %s871_s24 = sadd.s32 1, %s808_s21   ;;  %s28_s25 = sadd.s32 1, %s804_s20 }
   0x7   : > { %s25_s26 = ssub.s32 %s808_s21, %s871_s24  ;;  %p35_p0 = scmp.ne.s32.totalorder %s804_s20, %s800_s19 }
   0x8   : > { %p26_p1 = scmp.eq.s32.totalorder %s25_s26, 0  ;;  %p36_p2 = scmp.eq.s32.totalorder %s808_s21, 0 }
   0x9   : > { %p41_p3 = scmp.ne.s32.totalorder %s800_s19, %s796_s18  ;;  %p42_p4 = scmp.eq.s32.totalorder %s867_s22, 0 }
   0xa   : > { %s883_s27 = scalar_select %p26_p1, %s804_s20, %s28_s25  }
   0xb   : > { %p885_p5 = por %p36_p2, %p35_p0  ;;  %p889_p6 = por %p42_p4, %p41_p3 }
   0xc   : > { %p149_p7 = scmp.eq.s32.totalorder %s867_s22, 1  ;;  %p155_p8 = scmp.eq.s32.totalorder %s613_s23, 1 }
   0xd   : > { %p653_p10 = scmp.lt.s32.totalorder %s808_s21, 2  ;;  %s187_s7 = sand.u32 1, %s804_s20  }
   0xe   : > { %p896_p11 = por %p149_p7, %p35_p0  ;;  %p900_p12 = por %p155_p8, %p41_p3 }
   0xf   : > { %s637_s8 = sshll.u32 %s808_s21, 6  ;;  %s616_s9 = sshll.u32 %s187_s7, 6 }
  0x10   : > { %s196_s12 = scalar_lea.hbm %s1051_s0, %s637_s8  ;;  %s191_s14 = scalar_lea.vmem [#allocation2], %s616_s9 }
  0x11   : > { %s197_s13 = sshll.u32 %s196_s12, 4  ;;  %s199_s15 = sshll.u32 %s191_s14, 4  ;;  %s198_s13 = int_to_ptr.hbm [resolvable:$true] %s197_s13  ;;  %s200_s15 = int_to_ptr.vmem [resolvable:$true] %s199_s15 }
  0x12   : > { %p911_p13 = pnand %p653_p10, %p885_p5  ;;  %p619_p0 = scmp.ge.s32.totalorder %s808_s21, 1 }
  0x13   : > { %p207_p1 = scmp.lt.s32.totalorder %s808_s21, 3  ;;  %s188_s17 = scalar_lea.sflag [#allocation3], %s187_s7 }
  0x14   : > { %s712_s23 = sshra.s32 %s198_s13, 4  ;;  %p716_p3 = pneg %p911_p13  ;;  %s713_s23 = int_to_ptr.hbm [resolvable:$true] %s712_s23 }
  0x15   : > { %s714_s25 = scalar_lea.hbm %s713_s23, 64  ;;  %s719_s28 = scalar_lea.hbm %s1051_s0, 128 }
  0x16   : > { %p715_p2 = scmp.ne.s32.totalorder %s713_s23, %s714_s25  ;;  %p720_p5 = scmp.lt.s32.totalorder %s713_s23, %s1051_s0 }
  0x17   : > { %p721_p8 = scmp.lt.s32.totalorder %s719_s28, %s714_s25 }
  0x18   : > { %p717_p4 = pnand %p716_p3, %p715_p2 }
  0x19   : > { %p722_p10 = por %p721_p8, %p720_p5 }
  0x1a   : > { %p718_p7 = pneg %p717_p4 }
  0x1c   : > { %p723_p9 = pnand %p722_p10, %p718_p7 }
  0x1e   : > { %726 = shalt.err (!%p723_p9)
}
  0x1f   : > { %s810_s7 = smov 256   ;;  %s811_s11 = smov 16  }
  0x20   : > { %648 = dma.hbm_to_vmem [thread:$0]  (!%p911_p13), %s198_s13, 1024, %s200_s15, %s188_s17, %s810_s7, %s810_s7, %s811_s11  }
  0x21   : > { %p208_p2 = pnand %p619_p0, %p207_p1 }
  0x22   : > { %s932_s12 = sand.u32 (!%p208_p2), 1, %s800_s19  }
  0x23   : > { %211 = sbr.rel (%p208_p2) target bundleno = 721 (0x2d1), region = 40  ;;  %s620_s14 = sshll.u32 (!%p208_p2), %s932_s12, 6 }
  0x24   : > { %s214_s23 = scalar_lea.sflag (!%p208_p2), [#allocation3], %s932_s12  ;;  %s217_s25 = scalar_lea.vmem (!%p208_p2), [#allocation2], %s620_s14 }
  0x28   : > { %787 = dma.done.wait (%p889_p6), %s214_s23, 1024  }
  0x29   : > { %789 = vsyncadd (%p889_p6), %s214_s23, 4294966272  ;;  %v942_v0 = vld [vmem:[%s217_s25 + $0x30] sm:$0xff]  ;;  %v944_v1 = vld [vmem:[%s217_s25 + $0x38] sm:$0xff]  ;;  %v812_v17 = vmov 0   ;;  %vm281_vm0 = vcmask 7168   ;;  %vm293_vm1 = vcmask 261120  }
  0x2a   : > { %v946_v2 = vld [vmem:[%s217_s25 + $0x20] sm:$0xff]  ;;  %v262_v3 = vadd.f32 %v944_v1, %v942_v0  ;;  %v274_v4 = vmax.f32 %v942_v0, %v944_v1  ;;  %v952_v5 = vld [vmem:[%s217_s25 + $0x28] sm:$0xff]  ;;  %v956_v7 = vld [vmem:[%s217_s25 + $0x10] sm:$0xff]  ;;  %693 = vset.pattern.permute.xlu2 %v812_v17  ;;  %694 = vset.pattern.permute.xlu0 %v812_v17  ;;  %vm359_vm2 = vcmask 1041408   ;;  %vm346_vm3 = vcmask 15360   ;;  %s813_s8 = smov 127  }
  0x2b   : > { %v271_v6 = vmax.f32 %v946_v2, %v952_v5  ;;  %v958_v8 = vld [vmem:[%s217_s25 + $0x18] sm:$0xff]  ;;  %v960_v9 = vld [vmem:[%s217_s25] sm:$0xff]  ;;  %v962_v10 = vld [vmem:[%s217_s25 + $0x8] sm:$0xff]  ;;  %v259_v11 = vadd.f32 %v952_v5, %v946_v2  ;;  %695 = vset.pattern.permute.xlu1 %v812_v17  ;;  %s244_s28 = scalar_lea.vmem [#allocation5], %s620_s14  ;;  %s638_s9 = sshll.u32 %s867_s22, 6 }
  0x2c   : > { %263 = vadd.xlane.f32.xlu0 %v262_v3  ;;  %275 = vmax.xlane.f32.xlu1 %v274_v4  ;;  %v256_v12 = vadd.f32 %v958_v8, %v956_v7  ;;  %v253_v13 = vadd.f32 %v962_v10, %v960_v9  ;;  %v268_v14 = vmax.f32 %v956_v7, %v958_v8  ;;  %v287_v16 = vld [vmem:[%s1053_s2] sm:$0x3]  ;;  %v324_v18 = vld [vmem:[%s1055_s4 + $0x10] sm:$0xff]  ;;  %v325_v24 = vld [vmem:[%s1055_s4 + $0x18] sm:$0xff]  ;;  %s536_s7 = scalar_lea.hbm %s1056_s5, %s638_s9  ;;  %s537_s11 = sshll.u32 %s244_s28, 4  ;;  %s538_s11 = int_to_ptr.vmem [resolvable:$true] %s537_s11 }
  0x2d   : > { %272 = vmax.xlane.f32.xlu2 %v271_v6  ;;  %v265_v15 = vmax.f32 %v960_v9, %v962_v10  ;;  %v286_v36 = vld [vmem:[%s1052_s1] sm:$0x3]  ;;  %v323_v38 = vld [vmem:[%s1055_s4 + $0x8] sm:$0xff]  ;;  %v321_v45 = vld [vmem:[%s1054_s3 + $0x18] sm:$0xff]  ;;  %s539_s23 = sshll.u32 %s536_s7, 4  ;;  %s525_s25 = scalar_lea.sflag [#allocation4], %s932_s12  ;;  %s540_s23 = int_to_ptr.hbm [resolvable:$true] %s539_s23 }
  0x2e   : > { %v322_v37 = vld [vmem:[%s1055_s4] sm:$0xff]  ;;  %v319_v44 = vld [vmem:[%s1054_s3 + $0x8] sm:$0xff]  ;;  %v320_v46 = vld [vmem:[%s1054_s3 + $0x10] sm:$0xff]  ;;  %s756_s29 = sshra.s32 %s540_s23, 4  ;;  %s762_s16 = scalar_lea.hbm %s1056_s5, 128  ;;  %s757_s29 = int_to_ptr.hbm [resolvable:$true] %s756_s29 }
  0x2f   : > { %v318_v43 = vld [vmem:[%s1054_s3] sm:$0xff]  ;;  %s758_s22 = scalar_lea.hbm %s757_s29, 64  ;;  %p763_p0 = scmp.lt.s32.totalorder %s757_s29, %s1056_s5 }
  0x30   : > { %p759_p6 = scmp.ne.s32.totalorder %s757_s29, %s758_s22  ;;  %p764_p1 = scmp.lt.s32.totalorder %s762_s16, %s758_s22 }
  0x32   : > { %p760_p9 = pnand %p759_p6, %p896_p11  ;;  %p765_p3 = por %p764_p1, %p763_p0 }
  0x34   : > { %260 = vadd.xlane.f32.xlu0 %v259_v11  ;;  %257 = vadd.xlane.f32.xlu1 %v256_v12  ;;  %p761_p13 = pneg %p760_p9 }
  0x35   : > { %254 = vadd.xlane.f32.xlu2 %v253_v13 }
  0x36   : > { %p766_p4 = pnand %p765_p3, %p761_p13 }
  0x3c   : > { %269 = vmax.xlane.f32.xlu0 %v268_v14  ;;  %266 = vmax.xlane.f32.xlu1 %v265_v15 }
  0x4d   : > { %290 = vperm.xlu2 %693, %v287_v16  }
  0x50   : > { %328 = vperm.xlu0 %694, %v322_v37  }
  0x55   : > { %338 = vperm.xlu2 %693, %v324_v18   ;;  %333 = vperm.xlu1 %695, %v323_v38  }
  0x5d   : > { %343 = vperm.xlu2 %693, %v325_v24  }
  0x9f   : > { %v264_v19 = vpop.xlane.xlu0 %263  ;;  %v276_v20 = vpop.xlane.xlu1 %275 }
  0xa0   : > { %v280_v21 = vmul.f32 0.00390625, %v264_v19  ;;  %v273_v22 = vpop.xlane.xlu2 %272 }
  0xa2   : > { %v285_v23 = vsel %vm281_vm0, %v280_v21, %v276_v20 }
  0xa3   : > { %309 = vmatpush.msra.mxu0 %v285_v23 }
  0xa7   : > { %v261_v25 = vpop.xlane.xlu0 %260  ;;  %v258_v26 = vpop.xlane.xlu1 %257 }
  0xa8   : > { %v279_v27 = vmul.f32 0.00390625, %v261_v25  ;;  %v255_v28 = vpop.xlane.xlu2 %254  ;;  %v278_v31 = vmul.f32 0.00390625, %v258_v26 }
  0xa9   : > { %v277_v30 = vmul.f32 0.00390625, %v255_v28 }
  0xaa   : > { %v284_v29 = vsel %vm281_vm0, %v279_v27, %v273_v22 }
  0xab   : > { %310 = vmatpush.msra.mxu0 %v284_v29 }
  0xaf   : > { %v270_v32 = vpop.xlane.xlu0 %269  ;;  %v267_v33 = vpop.xlane.xlu1 %266 }
  0xb0   : > { %v283_v34 = vsel %vm281_vm0, %v278_v31, %v270_v32  ;;  %v282_v35 = vsel %vm281_vm0, %v277_v30, %v267_v33  ;;  %v291_v39 = vpop.permute.xlu2 %290 }
  0xb1   : > { %311 = vmatpush.msra.mxu0 %v283_v34 }
  0xb3   : > { %312 = vmatpush.msra.mxu0 %v282_v35 }
  0xb4   : > { %622 = vmatmul.msk.f32.vlgmr.msra.gmra.mxu0 %vm293_vm1, %v286_v36 }
  0xb8   : > { %v339_v47 = vpop.permute.xlu2 %338 }
  0xc0   : > { %v344_v52 = vpop.permute.xlu2 %343 }
  0xc2   : > { %v329_v48 = vpop.permute.xlu0 %328 }
  0xc7   : > { %v334_v51 = vpop.permute.xlu1 %333 }
 0x131   : > { %v314_v40 = vpop.f32.mrf.mxu0 }
 0x132   : > { %v315_v41 = vadd.f32 %v314_v40, %v291_v39 }
 0x134   : > { %v317_v42 = vmax.f32 %v315_v41, 0.0 }
 0x136   : > { %623 = vmatpush.msk.msra.mxu1 %vm359_vm2, %v317_v42  ;;  %639 = vmatpush.msk.msra.mxu2 %vm359_vm2, %v317_v42 }
 0x137   : > { %640 = vmatpush.msk.msra.mxu3 %vm359_vm2, %v317_v42  ;;  %624 = vmatmul.msk.f32.vlgmr.msra.gmra.mxu1 %vm346_vm3, %v318_v43 }
 0x138   : > { %625 = vmatmul.msk.f32.vlgmr.msra.gmra.mxu2 %vm346_vm3, %v319_v44  ;;  %627 = vmatmul.msk.f32.vlgmr.msra.gmra.mxu3 %vm346_vm3, %v321_v45 }
 0x140   : > { %626 = vmatmul.msk.f32.gmra.mxu2 %vm346_vm3, %v320_v46 }
 0x1b4   : > { %v380_v49 = vpop.f32.mrf.mxu1 }
 0x1b5   : > { %v381_v50 = vadd.f32 %v380_v49, %v329_v48 }
 0x1b7   : > { %396 = vrot.lane.b32.xlu1 %v381_v50, %s813_s8 }
 0x1bb   : > { %v383_v53 = vpop.f32.mrf.mxu2  ;;  %v389_v54 = vpop.f32.mrf.mxu3 }
 0x1bc   : > { %v384_v55 = vadd.f32 %v383_v53, %v334_v51  ;;  %v390_v56 = vadd.f32 %v389_v54, %v344_v52 }
 0x1be   : > { %398 = vrot.lane.b32.xlu2 %v384_v55, %s813_s8  ;;  %402 = vrot.lane.b32.xlu0 %v390_v56, %s813_s8 }
 0x1c3   : > { %v386_v57 = vpop.f32.mrf.mxu2 }
 0x1c4   : > { %v387_v58 = vadd.f32 %v386_v57, %v339_v47 }
 0x1c6   : > { %400 = vrot.lane.b32.xlu1 %v387_v58, %s813_s8 }
 0x218   : > { %v399_v59 = vpop.permute.xlu2 %398 }
 0x219   : > { %v409_v60 = vadd.f32 %v399_v59, %v384_v55 }
 0x21b   : > { %v629_v61 = vmul.f32 -1.442695, %v409_v60 }
 0x21d   : > { %696 = vpow2.f32 %v629_v61 }
 0x223   : > { %v697_v62 = vpop.eup %696 }
 0x224   : > { %v425_v63 = vadd.f32 1.0, %v697_v62 }
 0x226   : > { %698 = vrcp.f32 %v425_v63  ;;  %v454_v15 = vand.u32 2147483648, %v425_v63  ;;  %v452_v18 = vand.u32 2147483647, %v425_v63  ;;  %vm448_vm5 = vweird.f32 %v425_v63 }
 0x228   : > { %v455_v22 = vor.u32 1.1754944e-38, %v454_v15  ;;  %vm453_vm7 = vcmp.eq.f32.partialorder %v452_v18, 8.507059e+37 }
 0x229   : > { %v397_v3 = vpop.permute.xlu1 %396 }
 0x22a   : > { %v408_v4 = vadd.f32 %v397_v3, %v381_v50 }
 0x22c   : > { %v699_v6 = vpop.eup %698  ;;  %v628_v11 = vmul.f32 -1.442695, %v408_v4 }
 0x22d   : > { %v444_v12 = vmul.f32 %v699_v6, %v425_v63  ;;  %vm449_vm4 = vweird.f32 %v699_v6 }
 0x22e   : > { %700 = vpow2.f32 %v628_v11  ;;  %vm450_vm6 = vmor %vm448_vm5, %vm449_vm4 }
 0x22f   : > { %v445_v13 = vsub.f32 1.0, %v444_v12 }
 0x230   : > { %v403_v14 = vpop.permute.xlu0 %402 }
 0x231   : > { %v411_v16 = vadd.f32 %v403_v14, %v390_v56  ;;  %v446_v17 = vmul.f32 %v699_v6, %v445_v13 }
 0x233   : > { %v631_v19 = vmul.f32 -1.442695, %v411_v16  ;;  %v447_v20 = vadd.f32 %v699_v6, %v446_v17 }
 0x234   : > { %v701_v21 = vpop.eup %700 }
 0x235   : > { %v424_v23 = vadd.f32 1.0, %v701_v21  ;;  %702 = vpow2.f32 %v631_v19  ;;  %v451_v24 = vsel %vm450_vm6, %v699_v6, %v447_v20 }
 0x236   : > { %v456_v25 = vsel %vm453_vm7, %v455_v22, %v451_v24 }
 0x237   : > { %704 = vrcp.f32 %v424_v23  ;;  %495 = vperm.xlu1 %695, %v456_v25   ;;  %v439_v34 = vand.u32 2147483648, %v424_v23  ;;  %v437_v36 = vand.u32 2147483647, %v424_v23  ;;  %vm433_vm9 = vweird.f32 %v424_v23 }
 0x238   : > { %v401_v26 = vpop.permute.xlu1 %400 }
 0x239   : > { %v410_v27 = vadd.f32 %v401_v26, %v387_v58  ;;  %v440_v41 = vor.u32 1.1754944e-38, %v439_v34  ;;  %vm438_vm11 = vcmp.eq.f32.partialorder %v437_v36, 8.507059e+37 }
 0x23b   : > { %v703_v28 = vpop.eup %702  ;;  %v630_v29 = vmul.f32 -1.442695, %v410_v27 }
 0x23c   : > { %v427_v30 = vadd.f32 1.0, %v703_v28 }
 0x23d   : > { %v705_v31 = vpop.eup %704  ;;  %706 = vpow2.f32 %v630_v29 }
 0x23e   : > { %708 = vrcp.f32 %v427_v30  ;;  %v429_v32 = vmul.f32 %v705_v31, %v424_v23  ;;  %vm434_vm8 = vweird.f32 %v705_v31  ;;  %v484_v47 = vand.u32 2147483648, %v427_v30 }
 0x23f   : > { %vm435_vm10 = vmor %vm433_vm9, %vm434_vm8  ;;  %v482_v48 = vand.u32 2147483647, %v427_v30  ;;  %vm478_vm13 = vweird.f32 %v427_v30 }
 0x240   : > { %v430_v33 = vsub.f32 1.0, %v429_v32  ;;  %v485_v52 = vor.u32 1.1754944e-38, %v484_v47 }
 0x241   : > { %vm483_vm15 = vcmp.eq.f32.partialorder %v482_v48, 8.507059e+37 }
 0x242   : > { %v431_v35 = vmul.f32 %v705_v31, %v430_v33 }
 0x243   : > { %v707_v37 = vpop.eup %706 }
 0x244   : > { %v709_v38 = vpop.eup %708  ;;  %v426_v39 = vadd.f32 1.0, %v707_v37  ;;  %v432_v40 = vadd.f32 %v705_v31, %v431_v35 }
 0x245   : > { %v474_v42 = vmul.f32 %v709_v38, %v427_v30  ;;  %vm479_vm12 = vweird.f32 %v709_v38 }
 0x246   : > { %710 = vrcp.f32 %v426_v39  ;;  %v436_v43 = vsel %vm435_vm10, %v705_v31, %v432_v40  ;;  %vm480_vm14 = vmor %vm478_vm13, %vm479_vm12  ;;  %v469_v56 = vand.u32 2147483648, %v426_v39  ;;  %v467_v58 = vand.u32 2147483647, %v426_v39 }
 0x247   : > { %v441_v44 = vsel %vm438_vm11, %v440_v41, %v436_v43  ;;  %v475_v45 = vsub.f32 1.0, %v474_v42  ;;  %vm463_vm1 = vweird.f32 %v426_v39 }
 0x248   : > { %490 = vperm.xlu2 %693, %v441_v44   ;;  %v470_v60 = vor.u32 1.1754944e-38, %v469_v56  ;;  %vm468_vm3 = vcmp.eq.f32.partialorder %v467_v58, 8.507059e+37 }
 0x249   : > { %v476_v46 = vmul.f32 %v709_v38, %v475_v45 }
 0x24b   : > { %v477_v49 = vadd.f32 %v709_v38, %v476_v46 }
 0x24c   : > { %v711_v50 = vpop.eup %710 }
 0x24d   : > { %v481_v51 = vsel %vm480_vm14, %v709_v38, %v477_v49  ;;  %v459_v53 = vmul.f32 %v711_v50, %v426_v39  ;;  %vm464_vm0 = vweird.f32 %v711_v50 }
 0x24e   : > { %v486_v54 = vsel %vm483_vm15, %v485_v52, %v481_v51  ;;  %vm465_vm2 = vmor %vm463_vm1, %vm464_vm0 }
 0x24f   : > { %v460_v55 = vsub.f32 1.0, %v459_v53 }
 0x250   : > { %505 = vperm.xlu2 %693, %v486_v54  }
 0x251   : > { %v461_v57 = vmul.f32 %v711_v50, %v460_v55 }
 0x253   : > { %v462_v59 = vadd.f32 %v711_v50, %v461_v57 }
 0x255   : > { %v466_v61 = vsel %vm465_vm2, %v711_v50, %v462_v59 }
 0x256   : > { %v471_v62 = vsel %vm468_vm3, %v470_v60, %v466_v61 }
 0x257   : > { %500 = vperm.xlu0 %694, %v471_v62  }
 0x2a2   : > { %v491_v63 = vpop.permute.xlu2 %490 }
 0x2a3   : > { %v508_v3 = vmul.f32 %v491_v63, %v960_v9  ;;  %v509_v4 = vmul.f32 %v491_v63, %v962_v10 }
 0x2a5   : > { %516 = vst [vmem:[%s244_s28] sm:$0xff] %v508_v3 }
 0x2a6   : > { %517 = vst [vmem:[%s244_s28 + $0x8] sm:$0xff] %v509_v4 }
 0x2a9   : > { %v496_v6 = vpop.permute.xlu1 %495 }
 0x2aa   : > { %v510_v11 = vmul.f32 %v496_v6, %v956_v7  ;;  %v511_v12 = vmul.f32 %v496_v6, %v958_v8  ;;  %v506_v13 = vpop.permute.xlu2 %505 }
 0x2ab   : > { %v514_v14 = vmul.f32 %v506_v13, %v942_v0  ;;  %v515_v15 = vmul.f32 %v506_v13, %v944_v1 }
 0x2ac   : > { %518 = vst [vmem:[%s244_s28 + $0x10] sm:$0xff] %v510_v11 }
 0x2ad   : > { %519 = vst [vmem:[%s244_s28 + $0x18] sm:$0xff] %v511_v12 }
 0x2ae   : > { %522 = vst [vmem:[%s244_s28 + $0x30] sm:$0xff] %v514_v14 }
 0x2af   : > { %523 = vst [vmem:[%s244_s28 + $0x38] sm:$0xff] %v515_v15 }
 0x2c9   : > { %v501_v7 = vpop.permute.xlu0 %500 }
 0x2ca   : > { %v512_v8 = vmul.f32 %v501_v7, %v946_v2  ;;  %v513_v0 = vmul.f32 %v501_v7, %v952_v5 }
 0x2cc   : > { %520 = vst [vmem:[%s244_s28 + $0x20] sm:$0xff] %v512_v8 }
 0x2cd   : > { %521 = vst [vmem:[%s244_s28 + $0x28] sm:$0xff] %v513_v0 }
 0x2ce   : > { %769 = shalt.err (!%p766_p4)
}
 0x2cf   : > { %s814_s12 = smov 256   ;;  %s815_s8 = smov 16  }
 0x2d0   : > { %643 = dma.vmem_to_hbm [thread:$0]  (%p896_p11), %s538_s11, 1024, %s540_s23, %s525_s25, %s814_s12, %s814_s12, %s815_s8  }
 0x2d1 PF: > { %s554_s28 = sand.u32 1, %s796_s18   ;;  %p1062_p7 = scmp.ge.s32.totalorder %s808_s21, 2 }
 0x2d2   : > { %s555_s9 = scalar_lea.sflag [#allocation4], %s554_s28 }
 0x2d3   : > { %p650_p5 = pnand %p1062_p7, %p900_p12 }
 0x2d5   : > { %p651_p8 = pneg %p650_p5 }
 0x2d7   : > { %791 = dma.done.wait (%p651_p8), %s555_s9, 1024  }
 0x2d8   : > { %793 = vsyncadd (%p651_p8), %s555_s9, 4294966272  ;;  %p18_p10 = scmp.ge.s32.totalorder %s871_s24, 4   ;;  %s1063_s18 = smov %s800_s19 }
 0x2d9   : > { %s1064_s19 = smov %s804_s20  ;;  %s1065_s20 = smov %s883_s27 }
 0x2da   : > { %s1066_s21 = smov %s871_s24  ;;  %20 = sbr.rel (!%p18_p10) target bundleno = 5 (0x5), region = 85 }
 0x2df   :  { %561 = vsyncpa [#allocation3], 1 }
 0x2e0   :  { %563 = vsyncpa [#allocation3 + $0x1], 1 }
 0x2e1   :  { %564 = vsyncpa [#allocation4], 1 }
 0x2e2   :  { %566 = vsyncpa [#allocation4 + $0x1], 1 }

</bundles_post_ra>
